<compile_context>
chip_gen: v6e
topology: v6e:2x2x1
jax: 0.10.0
libtpu: 0.0.40
codegen_flags: <defaults>
</compile_context>

<pallas_src>
import functools

import jax
import jax.numpy as jnp
from jax.experimental import pallas as pl
from jax.experimental.pallas import tpu as pltpu

_LANE = 128
_VMEM_LIMIT = 48 * 1024 * 1024  # <=48 MiB: fits v7x (64 MiB/TC) with headroom, trivially v5e/v6e.


def _round_up(x: int, m: int) -> int:
    return ((x + m - 1) // m) * m


def _pad2d(a: jax.Array, rows: int, cols: int) -> jax.Array:
    pr = rows - a.shape[0]
    pc = cols - a.shape[1]
    if pr or pc:
        a = jnp.pad(a, ((0, pr), (0, pc)))
    return a


def _pick_tile_and_pad(dim: int, gran: int, max_tile: int = 512):
    """Return (tile, padded_dim).

    tile is a multiple of `gran`, <= max_tile, and divides padded_dim. Prefers a
    tile that divides the granularity-aligned real dim so the large operand does
    not need a padded HBM copy.
    """
    dim_g = _round_up(dim, gran)
    if dim_g <= max_tile:
        return dim_g, dim_g  # single block along this axis
    t = (max_tile // gran) * gran
    best = gran
    while t >= gran:
        if dim_g % t == 0:
            best = t
            break
        t -= gran
    if best >= _LANE:
        return best, dim_g
    # Ragged dim with only tiny divisors: fall back to lane-sized tiles with
    # minimal extra padding.
    # TODO(synk): mask the ragged K/M edge in-kernel instead of padding the matrix.
    return _LANE, _round_up(dim, _LANE)


def _contract(m, x, adjoint: bool):
    """(m.T if adjoint else m) @ x without materializing a transpose."""
    if adjoint:
        # out[c, n] = sum_r m[r, c] * x[r, n]: contract dim 0 with dim 0; the MXU
        # consumes the transposed-LHS contraction directly (no XLU vxpose).
        return jax.lax.dot_general(
            m, x,
            dimension_numbers=(((0,), (0,)), ((), ())),
            preferred_element_type=jnp.float32,
        )
    return jnp.dot(m, x, preferred_element_type=jnp.float32)


def _matrix_kernel_single(m_ref, x_ref, o_ref, *, adjoint: bool):
    """Whole-problem-in-VMEM kernel (no grid) for small/medium operands."""
    o_ref[...] = _contract(m_ref[...], x_ref[...], adjoint).astype(o_ref.dtype)


def _matrix_kernel_tiled_inplace(m_ref, x_ref, o_ref, *, adjoint: bool):
    """Tiled kernel, f32 output: accumulate directly into the resident output block."""
    @pl.when(pl.program_id(2) == 0)
    def _():
        o_ref[...] = jnp.zeros_like(o_ref)

    o_ref[...] += _contract(m_ref[...], x_ref[...], adjoint)


def _matrix_kernel_tiled_acc(m_ref, x_ref, o_ref, acc_ref, *, adjoint: bool):
    """Tiled kernel, narrow output dtype: f32 scratch accumulator over the K axis."""
    @pl.when(pl.program_id(2) == 0)
    def _():
        acc_ref[...] = jnp.zeros_like(acc_ref)

    acc_ref[...] += _contract(m_ref[...], x_ref[...], adjoint)

    @pl.when(pl.program_id(2) == pl.num_programs(2) - 1)
    def _():
        o_ref[...] = acc_ref[...].astype(o_ref.dtype)


def matrix_forward(
    matrix: jax.Array,
    inputs: jax.Array,
    adjoint: bool = True,
    *,
    compute_dtype=None,
    max_tile: int = 512,
    single_block_bytes: int = 16 * 1024 * 1024,
) -> jax.Array:
    """Pallas equivalent of Matrix.forward.

    matrix: [num_rows, num_cols]
    inputs: [num_rows, rank] if adjoint else [num_cols, rank]
    returns [num_cols, rank] if adjoint else [num_rows, rank]
    """
    num_rows, num_cols = matrix.shape
    k, rank = inputs.shape
    expected_k = num_rows if adjoint else num_cols
    assert k == expected_k, f"inputs leading dim {k} != expected {expected_k}"
    out_rows = num_cols if adjoint else num_rows
    out_dtype = jnp.result_type(matrix.dtype, inputs.dtype)

    m_work, x_work = matrix, inputs
    if compute_dtype is not None:
        # Optional low-precision streaming (bf16 halves HBM bytes); f32 accumulate.
        m_work = m_work.astype(compute_dtype)
        x_work = x_work.astype(compute_dtype)

    # Lane-dense N: pad rank (the MXU N dim) to a multiple of 128 so output
    # stores are unmasked full-lane vst; slice the padding off at the end.
    rank_p = _round_up(max(rank, _LANE), _LANE)
    x_p = _pad2d(x_work, k, rank_p)

    m_item = jnp.dtype(m_work.dtype).itemsize
    x_item = jnp.dtype(x_work.dtype).itemsize
    o_item = jnp.dtype(out_dtype).itemsize
    footprint = (num_rows * num_cols * m_item
                 + k * rank_p * x_item
                 + out_rows * rank_p * o_item)

    if footprint <= single_block_bytes:
        # Small/medium problem: single no-grid VMEM-resident invocation (no
        # per-step overhead, no matrix pad, no accumulator machinery;
        # full-array blocks are exempt from the (8,128) divisibility rule).
        # TODO(synk): for many tiny Matrix instances, batch them into one
        # pallas_call with a leading grid axis instead of one call per matmul.
        out_p = pl.pallas_call(
            functools.partial(_matrix_kernel_single, adjoint=adjoint),
            out_shape=jax.ShapeDtypeStruct((out_rows, rank_p), out_dtype),
            in_specs=[
                pl.BlockSpec(memory_space=pltpu.MemorySpace.VMEM),
                pl.BlockSpec(memory_space=pltpu.MemorySpace.VMEM),
            ],
            out_specs=pl.BlockSpec(memory_space=pltpu.MemorySpace.VMEM),
            compiler_params=pltpu.CompilerParams(vmem_limit_bytes=_VMEM_LIMIT),
        )(m_work, x_p)
        return out_p[:, :rank] if rank_p != rank else out_p

    # ---------------- Tiled path for large matrices ----------------
    # M = output rows, N = rank_p (lane-dense), K = contraction length.
    M, K = out_rows, k

    # Sublane granularity for the compute dtype (8 for f32, 16 for bf16, ...).
    sub_gran = max(8, 32 // min(m_item, x_item, o_item))
    if adjoint:
        m_gran, k_gran = _LANE, sub_gran   # matrix is [K, M]; M is its lane dim
    else:
        m_gran, k_gran = sub_gran, _LANE   # matrix is [M, K]; K is its lane dim

    tm, Mp = _pick_tile_and_pad(M, m_gran, max_tile)
    tk, Kp = _pick_tile_and_pad(K, k_gran, max_tile)
    # Collapse the N axis to a single block whenever rank_p <= max_tile, so the
    # matrix is streamed from HBM exactly once.
    tn, Np = _pick_tile_and_pad(rank_p, _LANE, max_tile)

    # v7x megacore: keep at least 2 parallel blocks when possible so both
    # TensorCores get work (no effect on 1-TC v5e/v6e correctness or perf).
    if (Mp // tm) * (Np // tn) < 2 and Mp // 2 >= m_gran and (Mp // 2) % m_gran == 0:
        tm = Mp // 2

    x_p = _pad2d(x_p, Kp, Np)
    if adjoint:
        # matrix layout is [K, M]; contraction uses dim 0 directly (no transpose).
        m_p = _pad2d(m_work, Kp, Mp)            # usually a no-op (tiles divide real dims)
        m_spec = pl.BlockSpec((tk, tm), lambda i, j, kk: (kk, i))
    else:
        # matrix layout is [M, K].
        m_p = _pad2d(m_work, Mp, Kp)            # usually a no-op
        m_spec = pl.BlockSpec((tm, tk), lambda i, j, kk: (i, kk))

    grid = (Mp // tm, Np // tn, Kp // tk)
    cost = pl.CostEstimate(
        flops=2 * Mp * Np * Kp,
        transcendentals=0,
        bytes_accessed=m_p.size * m_item + x_p.size * x_item + Mp * Np * o_item,
    )

    if jnp.dtype(out_dtype) == jnp.float32:
        # f32 output block is VMEM-resident across the K axis: accumulate in place,
        # no scratch accumulator, no extra store pass.
        kernel = functools.partial(_matrix_kernel_tiled_inplace, adjoint=adjoint)
        scratch = []
    else:
        kernel = functools.partial(_matrix_kernel_tiled_acc, adjoint=adjoint)
        scratch = [pltpu.VMEM((tm, tn), jnp.float32)]

    out_p = pl.pallas_call(
        kernel,
        out_shape=jax.ShapeDtypeStruct((Mp, Np), out_dtype),
        grid=grid,
        in_specs=[
            m_spec,
            pl.BlockSpec((tk, tn), lambda i, j, kk: (kk, j)),
        ],
        out_specs=pl.BlockSpec((tm, tn), lambda i, j, kk: (i, j)),
        scratch_shapes=scratch,
        compiler_params=pltpu.CompilerParams(
            dimension_semantics=("parallel", "parallel", "arbitrary"),
            vmem_limit_bytes=_VMEM_LIMIT,
        ),
        cost_estimate=cost,
    )(m_p, x_p)
    return out_p[:M, :rank]


if __name__ == "__main__":
    key = jax.random.PRNGKey(0)
    k1, k2, k3, k4, k5, k6 = jax.random.split(key, 6)

    # --- Small, module-typical shapes: single-block (no-grid) path ---
    num_rows, num_cols, rank = 32, 16, 8
    matrix = jax.random.normal(k1, (num_rows, num_cols), dtype=jnp.float32)
    x_adj = jax.random.normal(k2, (num_rows, rank), dtype=jnp.float32)
    x_noadj = jax.random.normal(k3, (num_cols, rank), dtype=jnp.float32)

    out_adj = jax.block_until_ready(matrix_forward(matrix, x_adj, adjoint=True))
    ref_adj = jnp.dot(matrix.T, x_adj, precision=jax.lax.Precision.HIGHEST)
    assert out_adj.shape == (num_cols, rank)
    assert jnp.allclose(out_adj, ref_adj, atol=1e-4, rtol=1e-4)

    out_noadj = jax.block_until_ready(matrix_forward(matrix, x_noadj, adjoint=False))
    ref_noadj = jnp.dot(matrix, x_noadj, precision=jax.lax.Precision.HIGHEST)
    assert out_noadj.shape == (num_rows, rank)
    assert jnp.allclose(out_noadj, ref_noadj, atol=1e-4, rtol=1e-4)

    # --- Moderate shapes, forced through the K-accumulating tiled path ---
    NR, NC, RK = 1024, 768, 200
    matrix_l = jax.random.normal(k4, (NR, NC), dtype=jnp.float32)
    xl_adj = jax.random.normal(k5, (NR, RK), dtype=jnp.float32)
    xl_noadj = jax.random.normal(k6, (NC, RK), dtype=jnp.float32)

    out_l_adj = jax.block_until_ready(
        matrix_forward(matrix_l, xl_adj, adjoint=True, single_block_bytes=1))
    ref_l_adj = jnp.dot(matrix_l.T, xl_adj, precision=jax.lax.Precision.HIGHEST)
    assert out_l_adj.shape == (NC, RK)
    assert jnp.allclose(out_l_adj, ref_l_adj, atol=1e-3, rtol=1e-3)

    out_l_noadj = jax.block_until_ready(
        matrix_forward(matrix_l, xl_noadj, adjoint=False, single_block_bytes=1))
    ref_l_noadj = jnp.dot(matrix_l, xl_noadj, precision=jax.lax.Precision.HIGHEST)
    assert out_l_noadj.shape == (NR, RK)
    assert jnp.allclose(out_l_noadj, ref_l_noadj, atol=1e-3, rtol=1e-3)

    print("KERNEL_OK")
</pallas_src>

<mosaic_0001>
module attributes {stable_mosaic.version = 11 : i64} {
  func.func @_matrix_kernel_single(%arg0: memref<32x16xf32, #tpu.memory_space<vmem>>, %arg1: memref<32x128xf32, #tpu.memory_space<vmem>>, %arg2: memref<16x128xf32, #tpu.memory_space<vmem>>) attributes {dimension_semantics = [], scalar_prefetch = 0 : i64, scratch_operands = 0 : i64, tpu.core_type = #tpu.core_type<tc>} {
    %c0 = arith.constant 0 : index
    %c0_0 = arith.constant 0 : index
    %0 = vector.load %arg0[%c0, %c0_0] : memref<32x16xf32, #tpu.memory_space<vmem>>, vector<32x16xf32>
    %c0_1 = arith.constant 0 : index
    %c0_2 = arith.constant 0 : index
    %1 = vector.load %arg1[%c0_1, %c0_2] : memref<32x128xf32, #tpu.memory_space<vmem>>, vector<32x128xf32>
    %cst = arith.constant dense<0.000000e+00> : vector<16x128xf32>
    %2 = tpu.matmul %0, %1, %cst {dimension_numbers = #tpu.dot_dimension_numbers<[0], [0], [1], [1], [0, 1, 1, 1], [], []>} : vector<32x16xf32>, vector<32x128xf32>, vector<16x128xf32> -> vector<16x128xf32>
    %c0_3 = arith.constant 0 : index
    %c0_4 = arith.constant 0 : index
    %3 = vector.load %arg2[%c0_3, %c0_4] : memref<16x128xf32, #tpu.memory_space<vmem>>, vector<16x128xf32>
    tpu.vector_store %arg2[%c0_3, %c0_4], %2 {strides = array<i32>} : memref<16x128xf32, #tpu.memory_space<vmem>>, vector<16x128xf32>,
    return
  }
}

</mosaic_0001>

<bundles_post_ra>
// kernel: tpu_custom_call.1
= control target key start
LH: loop header
LB: loop body
LE: loop exit
PB: predicated region body
PF: predicated region fallthrough
CT: control target
= control target key end

     0   :  { %s242_s0 = inlined_call_operand.vmem [shape: f32[32,16], index: 0, kind: input, shape index: {}]   ;;  %s243_s1 = inlined_call_operand.vmem [shape: f32[32,128], index: 1, kind: input, shape index: {}]   ;;  %s244_s2 = inlined_call_operand.hbm [shape: f32[16,128], index: 2, kind: output, shape index: {}]  }
   0x1   :  { %v12_v0 = vld [vmem:[%s242_s0] sm:$0xff]  ;;  %v19_v1 = vld [vmem:[%s243_s1 + $0x18] sm:$0xff]  ;;  %v18_v2 = vld [vmem:[%s243_s1 + $0x10] sm:$0xff] }
   0x2   :  { %20 = vxpose.xlu0.b32.start [1/4] (short) (narrow) %v12_v0, 16  ;;  %v13_v3 = vld [vmem:[%s242_s0 + $0x8] sm:$0xff]  ;;  %160 = vmatprep.subr.mxu0 %v19_v1 }
   0x3   :  { %7 = vsyncpa [#allocation3], 0  ;;  %161 = vmatpush3.msra.mxu0 %v19_v1  ;;  %v17_v4 = vld [vmem:[%s243_s1 + $0x8] sm:$0xff]  ;;  %v16_v5 = vld [vmem:[%s243_s1] sm:$0xff]  ;;  %vm52_vm0 = vcmask 261120   ;;  %s197_s1 = smov [#allocation2]  }
   0x4   :  { %162 = vmatprep.subr.mxu0 %v18_v2  ;;  %v14_v6 = vld [vmem:[%s242_s0 + $0x10] sm:$0xff]  ;;  %v15_v7 = vld [vmem:[%s242_s0 + $0x18] sm:$0xff]  ;;  %s141_s25 = sshll.u32 %s197_s1, 4  ;;  %s142_s25 = int_to_ptr.vmem [resolvable:$true] %s141_s25 }
   0x5   :  { %163 = vmatpush3.msra.mxu0 %v18_v2  ;;  %s175_s26 = scalar_lea.vmem %s142_s25, 256  ;;  %p180_p1 = scmp.lt.s32.totalorder %s142_s25, %s142_s25 }
   0x6   :  { %21 = vxpose.xlu0.b32.cont [2/4] (short) (narrow) %v13_v3, 16  ;;  %164 = vmatprep.subr.mxu0 %v17_v4  ;;  %p176_p0 = scmp.ne.s32.totalorder %s142_s25, %s175_s26  ;;  %p181_p2 = scmp.lt.s32.totalorder %s175_s26, %s175_s26 }
   0x7   :  { %165 = vmatpush3.msra.mxu0 %v17_v4 }
   0x8   :  { %166 = vmatprep.subr.mxu0 %v16_v5  ;;  %p182_p3 = por %p181_p2, %p180_p1 }
   0x9   :  { %167 = vmatpush3.msra.mxu0 %v16_v5 }
   0xa   :  { %22 = vxpose.xlu0.b32.cont [3/4] (short) (narrow) %v14_v6, 16  ;;  %p183_p4 = pnand %p182_p3, %p176_p0 }
   0xe   :  { %23 = vxpose.xlu0.b32.end [4/4] (short) (narrow) %v15_v7, 16 }
  0x7e   :  { %v36_v8 = vpop.trf.xlu0 }
  0x7f   :  { %168 = vmatprep.mubr.msk.f32.mxu0 %vm52_vm0, %v36_v8 }
  0x82   :  { %v37_v9 = vpop.trf.xlu0 }
  0x83   :  { %169 = vmatmul.mubr.msk.f32.vlgmr.msra.gmra.mxu0 %vm52_vm0, %v37_v9 }
 0x143   :  { %v170_v10 = vpop.f32.mrf.mxu0 }
 0x144   :  { %135 = vst [vmem:[#allocation2 + $0x8] sm:$0xff] %v170_v10 }
 0x145   :  { %v125_v11 = vpop.f32.mrf.mxu0 }
 0x146   :  { %134 = vst [vmem:[#allocation2] sm:$0xff] %v125_v11 }
 0x147   :  { %186 = shalt.err (!%p183_p4)
}
 0x148   :  { %s198_s0 = smov 128   ;;  %s199_s27 = smov 8  }
 0x149   :  { %147 = dma.vmem_to_hbm [thread:$0]  %s142_s25, 256, %s244_s2, [#allocation3], %s198_s0, %s198_s0, %s199_s27  }
 0x14a   :  { %195 = dma.done.wait [#allocation3], 256  }
 0x14b   :  { %196 = vsyncadd [#allocation3], 4294967040 }
 0x14c   :  { %151 = vsyncpa [#allocation3], 1 }

</bundles_post_ra>
